<compile_context>
chip_gen: v6e
topology: v6e:2x2x1
jax: 0.10.0
libtpu: 0.0.40
codegen_flags: <defaults>
</compile_context>

<pallas_src>
import jax
import jax.numpy as jnp
from jax.experimental import pallas as pl
from jax.experimental.pallas import tpu as pltpu


def _round_up(x, m):
    return (x + m - 1) // m * m


def _choose_batch_tiling(batch, tile_b):
    """Pick (tile, padded_batch, num_tiles) for the 1-D batch grid."""
    b_min = _round_up(batch, 8)                    # sublane alignment
    if b_min <= 256:
        tb = b_min                                 # tiny batch: one grid step
    else:
        # >= 2 tiles so both TensorCores on v7x get a slice; keep tiles
        # sublane-aligned and capped at tile_b.
        tb = min(tile_b, _round_up((b_min + 1) // 2, 8))
    b_pad = _round_up(b_min, tb)
    return tb, b_pad, b_pad // tb


def _sac_value_kernel(state_ref, action_ref, w1s_ref, w1a_ref, b1_ref,
                      w2_ref, b2_ref, w3_ref, b3_ref, o_ref):
    mm_dtype = w1s_ref.dtype

    # Layer 1: in-kernel "concat" as split-K (state rows + action rows of W1).
    h1 = jnp.dot(state_ref[...].astype(mm_dtype), w1s_ref[...],
                 preferred_element_type=jnp.float32)
    h1 = h1 + jnp.dot(action_ref[...].astype(mm_dtype), w1a_ref[...],
                      preferred_element_type=jnp.float32)
    h1 = jnp.maximum(h1 + b1_ref[...], 0.0)

    # Layer 2.
    h2 = jnp.dot(h1.astype(mm_dtype), w2_ref[...],
                 preferred_element_type=jnp.float32)
    h2 = jnp.maximum(h2 + b2_ref[...], 0.0)

    # Layer 3 (out_features == 1): VPU multiply + lane reduce; relayout the
    # (tb,) result into a lane-dense (1, tb) row (XLU; rides an idle unit).
    q = jnp.sum(h2 * w3_ref[...], axis=-1) + b3_ref[0]        # (tb,)
    o_ref[...] = q.reshape(1, -1).astype(o_ref.dtype)         # (1, tb)


def sac_value_network(state, action, params, *, tile_b=1024,
                      matmul_dtype=jnp.bfloat16):
    """Pallas implementation of SACValueNetwork.forward.

    state:  (B, Ds) float32
    action: (B, Da) float32,  Ds + Da == input_dim
    params: w1 (input_dim, H), b1 (H,), w2 (H, H), b2 (H,), w3 (H, 1), b3 (1,)
            (already in x @ W layout).
    returns (B,) float32 (scalar for B == 1), matching torch.squeeze.
    """
    B, Ds = state.shape
    Da = action.shape[1]
    D = Ds + Da
    H = params["w2"].shape[0]

    tb, b_pad, nb = _choose_batch_tiling(B, tile_b)
    if b_pad != B:
        state = jnp.pad(state, ((0, b_pad - B), (0, 0)))
        action = jnp.pad(action, ((0, b_pad - B), (0, 0)))

    # One-time, batch-independent parameter prep (tiny: <= D*H elements).
    w1s = params["w1"][:Ds, :].astype(matmul_dtype)            # (Ds, H)
    w1a = params["w1"][Ds:, :].astype(matmul_dtype)            # (Da, H)
    w2 = params["w2"].astype(matmul_dtype)                     # (H, H)
    b1 = params["b1"].reshape(1, H).astype(jnp.float32)
    b2 = params["b2"].reshape(1, H).astype(jnp.float32)
    w3 = params["w3"].reshape(1, H).astype(jnp.float32)        # row for VPU reduce
    b3 = params["b3"].reshape(1).astype(jnp.float32)           # SMEM scalar

    itemsize = jnp.dtype(matmul_dtype).itemsize
    cost = pl.CostEstimate(
        flops=2 * b_pad * (D * H + H * H + H),
        transcendentals=0,
        bytes_accessed=(b_pad * D * 4                          # state+action (f32)
                        + (D * H + H * H) * itemsize           # w1, w2
                        + (3 * H + 1) * 4                      # b1, b2, w3, b3
                        + b_pad * 4),                          # q out
    )

    out = pl.pallas_call(
        _sac_value_kernel,
        grid=(nb,),
        in_specs=[
            pl.BlockSpec((tb, Ds), lambda i: (i, 0)),   # state tile (pipelined)
            pl.BlockSpec((tb, Da), lambda i: (i, 0)),   # action tile (pipelined)
            pl.BlockSpec((Ds, H), lambda i: (0, 0)),    # w1 state rows: resident
            pl.BlockSpec((Da, H), lambda i: (0, 0)),    # w1 action rows: resident
            pl.BlockSpec((1, H), lambda i: (0, 0)),     # b1
            pl.BlockSpec((H, H), lambda i: (0, 0)),     # w2: resident
            pl.BlockSpec((1, H), lambda i: (0, 0)),     # b2
            pl.BlockSpec((1, H), lambda i: (0, 0)),     # w3 row
            pl.BlockSpec(memory_space=pltpu.MemorySpace.SMEM),  # b3 scalar
        ],
        out_specs=pl.BlockSpec((1, tb), lambda i: (i, 0)),      # lane-dense row
        out_shape=jax.ShapeDtypeStruct((nb, tb), jnp.float32),
        compiler_params=pltpu.CompilerParams(
            dimension_semantics=("parallel",)),         # shard batch on v7x's 2 TCs
        cost_estimate=cost,
    )(state, action, w1s, w1a, b1, w2, b2, w3, b3)

    # torch.squeeze on (B, 1): (B,) for B > 1, scalar for B == 1.
    # NOTE: padded rows carry nonzero garbage (ReLU(b1) propagates) -- always
    # slice to B before use.
    return jnp.squeeze(out.reshape(-1)[:B])


def init_params(key, input_dim=256, hidden_dim=256):
    """Deterministic parameter init (shapes match the nn.Module __init__)."""
    k1, k2, k3, k4, k5, k6 = jax.random.split(key, 6)

    def lin(kw, kb, fan_in, fan_out):
        bound = 1.0 / jnp.sqrt(fan_in)
        w = jax.random.uniform(kw, (fan_in, fan_out), jnp.float32, -bound, bound)
        b = jax.random.uniform(kb, (fan_out,), jnp.float32, -bound, bound)
        return w, b

    w1, b1 = lin(k1, k2, input_dim, hidden_dim)
    w2, b2 = lin(k3, k4, hidden_dim, hidden_dim)
    w3, b3 = lin(k5, k6, hidden_dim, 1)
    return {"w1": w1, "b1": b1, "w2": w2, "b2": b2, "w3": w3, "b3": b3}


def _reference(state, action, params, matmul_dtype):
    """Pure-JAX reference with the same matmul-input casts as the kernel."""
    hi = jax.lax.Precision.HIGHEST
    f32 = jnp.float32
    x = jnp.concatenate([state, action], axis=1).astype(matmul_dtype).astype(f32)
    w1 = params["w1"].astype(matmul_dtype).astype(f32)
    w2 = params["w2"].astype(matmul_dtype).astype(f32)
    h1 = jnp.maximum(jnp.dot(x, w1, precision=hi) + params["b1"], 0.0)
    h1c = h1.astype(matmul_dtype).astype(f32)
    h2 = jnp.maximum(jnp.dot(h1c, w2, precision=hi) + params["b2"], 0.0)
    q = jnp.dot(h2, params["w3"], precision=hi) + params["b3"]
    return jnp.squeeze(q)


if __name__ == "__main__":
    key = jax.random.PRNGKey(0)
    kp, ks = jax.random.split(key)

    input_dim, hidden_dim = 256, 256          # module defaults
    state_dim, action_dim = 160, 96           # state_dim + action_dim == input_dim

    params = init_params(kp, input_dim, hidden_dim)

    # batch=8: single grid step.  batch=300: padded, 2-tile grid with resident
    # weights (also the path v7x shards across its two TensorCores).
    for batch in (8, 300):
        kb = jax.random.fold_in(ks, batch)
        ks_b, ka_b = jax.random.split(kb)
        state = jax.random.normal(ks_b, (batch, state_dim), jnp.float32)
        action = jax.random.normal(ka_b, (batch, action_dim), jnp.float32)

        # Default bf16-matmul path (f32 accumulation).
        q = jax.block_until_ready(sac_value_network(state, action, params))
        ref = _reference(state, action, params, jnp.bfloat16)
        assert q.shape == (batch,)
        assert jnp.allclose(q, ref, atol=2e-3, rtol=2e-3)

        # f32-input path (looser tolerance: the MXU may realize f32 matmuls as
        # multi-pass bf16 internally).
        q32 = jax.block_until_ready(
            sac_value_network(state, action, params, matmul_dtype=jnp.float32))
        ref32 = _reference(state, action, params, jnp.float32)
        assert q32.shape == (batch,)
        assert jnp.allclose(q32, ref32, atol=1e-2, rtol=1e-2)

    print("KERNEL_OK")
</pallas_src>

<mosaic_0001>
module attributes {stable_mosaic.version = 11 : i64} {
  func.func @_sac_value_kernel(%arg0: i32, %arg1: memref<8x160xf32, #tpu.memory_space<vmem>>, %arg2: memref<8x96xf32, #tpu.memory_space<vmem>>, %arg3: memref<160x256xbf16, #tpu.memory_space<vmem>>, %arg4: memref<96x256xbf16, #tpu.memory_space<vmem>>, %arg5: memref<1x256xf32, #tpu.memory_space<vmem>>, %arg6: memref<256x256xbf16, #tpu.memory_space<vmem>>, %arg7: memref<1x256xf32, #tpu.memory_space<vmem>>, %arg8: memref<1x256xf32, #tpu.memory_space<vmem>>, %arg9: memref<1xf32, #tpu.memory_space<smem>>, %arg10: memref<1x8xf32, #tpu.memory_space<vmem>>) attributes {dimension_semantics = [#tpu.dimension_semantics<parallel>], iteration_bounds = array<i64: 1>, scalar_prefetch = 0 : i64, scratch_operands = 0 : i64, tpu.core_type = #tpu.core_type<tc>, window_params = [{transform_indices = @transform_0, window_bounds = array<i64: 8, 160>}, {transform_indices = @transform_1, window_bounds = array<i64: 8, 96>}, {pipeline_mode = #tpu.pipeline_mode<synchronous>, transform_indices = @transform_2, window_bounds = array<i64: 160, 256>}, {pipeline_mode = #tpu.pipeline_mode<synchronous>, transform_indices = @transform_3, window_bounds = array<i64: 96, 256>}, {pipeline_mode = #tpu.pipeline_mode<synchronous>, transform_indices = @transform_4, window_bounds = array<i64: 1, 256>}, {pipeline_mode = #tpu.pipeline_mode<synchronous>, transform_indices = @transform_5, window_bounds = array<i64: 256, 256>}, {pipeline_mode = #tpu.pipeline_mode<synchronous>, transform_indices = @transform_6, window_bounds = array<i64: 1, 256>}, {pipeline_mode = #tpu.pipeline_mode<synchronous>, transform_indices = @transform_7, window_bounds = array<i64: 1, 256>}, {transform_indices = @transform_8, window_bounds = array<i64: 1>}, {transform_indices = @transform_9, window_bounds = array<i64: 1, 8>}]} {
    %c0 = arith.constant 0 : index
    %c0_0 = arith.constant 0 : index
    %0 = vector.load %arg1[%c0, %c0_0] : memref<8x160xf32, #tpu.memory_space<vmem>>, vector<8x160xf32>
    %1 = arith.truncf %0 : vector<8x160xf32> to vector<8x160xbf16>
    %c0_1 = arith.constant 0 : index
    %c0_2 = arith.constant 0 : index
    %2 = vector.load %arg3[%c0_1, %c0_2] : memref<160x256xbf16, #tpu.memory_space<vmem>>, vector<160x256xbf16>
    %cst = arith.constant dense<0.000000e+00> : vector<8x256xf32>
    %3 = tpu.matmul %1, %2, %cst {dimension_numbers = #tpu.dot_dimension_numbers<[1], [0], [0], [1], [0, 0, 1, 1], [], []>} : vector<8x160xbf16>, vector<160x256xbf16>, vector<8x256xf32> -> vector<8x256xf32>
    %c0_3 = arith.constant 0 : index
    %c0_4 = arith.constant 0 : index
    %4 = vector.load %arg2[%c0_3, %c0_4] : memref<8x96xf32, #tpu.memory_space<vmem>>, vector<8x96xf32>
    %5 = arith.truncf %4 : vector<8x96xf32> to vector<8x96xbf16>
    %c0_5 = arith.constant 0 : index
    %c0_6 = arith.constant 0 : index
    %6 = vector.load %arg4[%c0_5, %c0_6] : memref<96x256xbf16, #tpu.memory_space<vmem>>, vector<96x256xbf16>
    %cst_7 = arith.constant dense<0.000000e+00> : vector<8x256xf32>
    %7 = tpu.matmul %5, %6, %cst_7 {dimension_numbers = #tpu.dot_dimension_numbers<[1], [0], [0], [1], [0, 0, 1, 1], [], []>} : vector<8x96xbf16>, vector<96x256xbf16>, vector<8x256xf32> -> vector<8x256xf32>
    %8 = arith.addf %3, %7 : vector<8x256xf32>
    %c0_8 = arith.constant 0 : index
    %c0_9 = arith.constant 0 : index
    %9 = vector.load %arg5[%c0_8, %c0_9] : memref<1x256xf32, #tpu.memory_space<vmem>>, vector<1x256xf32>
    %10 = vector.broadcast %9 : vector<1x256xf32> to vector<8x256xf32>
    %11 = arith.addf %8, %10 : vector<8x256xf32>
    %cst_10 = arith.constant 0.000000e+00 : f32
    %12 = vector.broadcast %cst_10 : f32 to vector<8x256xf32>
    %13 = arith.maximumf %11, %12 : vector<8x256xf32>
    %14 = arith.truncf %13 : vector<8x256xf32> to vector<8x256xbf16>
    %c0_11 = arith.constant 0 : index
    %c0_12 = arith.constant 0 : index
    %15 = vector.load %arg6[%c0_11, %c0_12] : memref<256x256xbf16, #tpu.memory_space<vmem>>, vector<256x256xbf16>
    %cst_13 = arith.constant dense<0.000000e+00> : vector<8x256xf32>
    %16 = tpu.matmul %14, %15, %cst_13 {dimension_numbers = #tpu.dot_dimension_numbers<[1], [0], [0], [1], [0, 0, 1, 1], [], []>} : vector<8x256xbf16>, vector<256x256xbf16>, vector<8x256xf32> -> vector<8x256xf32>
    %c0_14 = arith.constant 0 : index
    %c0_15 = arith.constant 0 : index
    %17 = vector.load %arg7[%c0_14, %c0_15] : memref<1x256xf32, #tpu.memory_space<vmem>>, vector<1x256xf32>
    %18 = vector.broadcast %17 : vector<1x256xf32> to vector<8x256xf32>
    %19 = arith.addf %16, %18 : vector<8x256xf32>
    %cst_16 = arith.constant 0.000000e+00 : f32
    %20 = vector.broadcast %cst_16 : f32 to vector<8x256xf32>
    %21 = arith.maximumf %19, %20 : vector<8x256xf32>
    %c0_17 = arith.constant 0 : index
    %c0_18 = arith.constant 0 : index
    %22 = vector.load %arg8[%c0_17, %c0_18] : memref<1x256xf32, #tpu.memory_space<vmem>>, vector<1x256xf32>
    %23 = vector.broadcast %22 : vector<1x256xf32> to vector<8x256xf32>
    %24 = arith.mulf %21, %23 : vector<8x256xf32>
    %cst_19 = arith.constant dense<0.000000e+00> : vector<8xf32>
    %25 = vector.multi_reduction <add>, %24, %cst_19 [1] : vector<8x256xf32> to vector<8xf32>
    %c0_20 = arith.constant 0 : index
    %26 = memref.load %arg9[%c0_20] : memref<1xf32, #tpu.memory_space<smem>>
    %27 = vector.broadcast %26 : f32 to vector<8xf32>
    %28 = arith.addf %25, %27 : vector<8xf32>
    %29 = vector.shape_cast %28 : vector<8xf32> to vector<1x8xf32>
    %c0_21 = arith.constant 0 : index
    %c0_22 = arith.constant 0 : index
    %30 = vector.load %arg10[%c0_21, %c0_22] : memref<1x8xf32, #tpu.memory_space<vmem>>, vector<1x8xf32>
    tpu.vector_store %arg10[%c0_21, %c0_22], %29 {strides = array<i32>} : memref<1x8xf32, #tpu.memory_space<vmem>>, vector<1x8xf32>,
    return
  }
  func.func @transform_0(%arg0: i32) -> (i32, i32) {
    %c0_i32 = arith.constant 0 : i32
    %c0_i32_0 = arith.constant 0 : i32
    return %arg0, %c0_i32 : i32, i32
  }
  func.func @transform_1(%arg0: i32) -> (i32, i32) {
    %c0_i32 = arith.constant 0 : i32
    %c0_i32_0 = arith.constant 0 : i32
    return %arg0, %c0_i32 : i32, i32
  }
  func.func @transform_2(%arg0: i32) -> (i32, i32) {
    %c0_i32 = arith.constant 0 : i32
    %c0_i32_0 = arith.constant 0 : i32
    %c0_i32_1 = arith.constant 0 : i32
    return %c0_i32, %c0_i32_0 : i32, i32
  }
  func.func @transform_3(%arg0: i32) -> (i32, i32) {
    %c0_i32 = arith.constant 0 : i32
    %c0_i32_0 = arith.constant 0 : i32
    %c0_i32_1 = arith.constant 0 : i32
    return %c0_i32, %c0_i32_0 : i32, i32
  }
  func.func @transform_4(%arg0: i32) -> (i32, i32) {
    %c0_i32 = arith.constant 0 : i32
    %c0_i32_0 = arith.constant 0 : i32
    %c0_i32_1 = arith.constant 0 : i32
    return %c0_i32, %c0_i32_0 : i32, i32
  }
  func.func @transform_5(%arg0: i32) -> (i32, i32) {
    %c0_i32 = arith.constant 0 : i32
    %c0_i32_0 = arith.constant 0 : i32
    %c0_i32_1 = arith.constant 0 : i32
    return %c0_i32, %c0_i32_0 : i32, i32
  }
  func.func @transform_6(%arg0: i32) -> (i32, i32) {
    %c0_i32 = arith.constant 0 : i32
    %c0_i32_0 = arith.constant 0 : i32
    %c0_i32_1 = arith.constant 0 : i32
    return %c0_i32, %c0_i32_0 : i32, i32
  }
  func.func @transform_7(%arg0: i32) -> (i32, i32) {
    %c0_i32 = arith.constant 0 : i32
    %c0_i32_0 = arith.constant 0 : i32
    %c0_i32_1 = arith.constant 0 : i32
    return %c0_i32, %c0_i32_0 : i32, i32
  }
  func.func @transform_8(%arg0: i32) -> i32 {
    %c0_i32 = arith.constant 0 : i32
    %c0_i32_0 = arith.constant 0 : i32
    return %c0_i32 : i32
  }
  func.func @transform_9(%arg0: i32) -> (i32, i32) {
    %c0_i32 = arith.constant 0 : i32
    %c0_i32_0 = arith.constant 0 : i32
    return %arg0, %c0_i32 : i32, i32
  }
}

</mosaic_0001>

<bundles_post_ra>
// kernel: tpu_custom_call.1
= control target key start
LH: loop header
LB: loop body
LE: loop exit
PB: predicated region body
PF: predicated region fallthrough
CT: control target
= control target key end

     0   :  { %15 = vsyncpa [#allocation4], 0  ;;  %s1096_s0 = inlined_call_operand.hbm [shape: f32[8,160], index: 0, kind: input, shape index: {}]   ;;  %s1097_s1 = inlined_call_operand.hbm [shape: f32[8,96], index: 1, kind: input, shape index: {}]   ;;  %s1098_s2 = inlined_call_operand.hbm [shape: bf16[160,256], index: 2, kind: input, shape index: {}]   ;;  %s1099_s3 = inlined_call_operand.hbm [shape: bf16[96,256], index: 3, kind: input, shape index: {}]   ;;  %s1100_s4 = inlined_call_operand.vmem [shape: f32[1,256], index: 4, kind: input, shape index: {}]   ;;  %s1101_s5 = inlined_call_operand.hbm [shape: bf16[256,256], index: 5, kind: input, shape index: {}]   ;;  %s1102_s6 = inlined_call_operand.vmem [shape: f32[1,256], index: 6, kind: input, shape index: {}]   ;;  %s1103_s7 = inlined_call_operand.vmem [shape: f32[1,256], index: 7, kind: input, shape index: {}]   ;;  %s1104_s8 = inlined_call_operand.<no memory space> [shape: f32[1], index: 8, kind: input, shape index: {}]   ;;  %s1105_s9 = inlined_call_operand.hbm [shape: f32[1,8], index: 9, kind: output, shape index: {}]  }
   0x1   :  { %16 = vsyncpa [#allocation7], 0 }
   0x2   :  { %17 = vsyncpa [#allocation10], 0 }
   0x3   :  { %18 = vsyncpa [#allocation5], 0  ;;  %s998_s30 = smov [#allocation6]  }
   0x4   :  { %s35_s10 = sshll.u32 %s998_s30, 4  ;;  %s36_s10 = int_to_ptr.vmem [resolvable:$true] %s35_s10 }
   0x5   :  { %s878_s11 = scalar_lea.vmem %s36_s10, 128  ;;  %p883_p1 = scmp.lt.s32.totalorder %s36_s10, %s36_s10 }
   0x6   :  { %p879_p0 = scmp.ne.s32.totalorder %s36_s10, %s878_s11  ;;  %p884_p2 = scmp.lt.s32.totalorder %s878_s11, %s878_s11 }
   0x8   :  { %p885_p3 = por %p884_p2, %p883_p1 }
   0xa   :  { %p886_p4 = pnand %p885_p3, %p879_p0 }
   0xc   :  { %889 = shalt.err (!%p886_p4)
}
   0xd   :  { %38 = dma.hbm_to_vmem [thread:$0]  %s1097_s1, 128, %s36_s10, [#allocation7]  }
   0xe   :  { %s999_s14 = smov [#allocation9]   ;;  %s1000_s16 = smov [#allocation3]  }
   0xf   :  { %s56_s15 = sshll.u32 %s999_s14, 4  ;;  %s25_s17 = sshll.u32 %s1000_s16, 4  ;;  %s57_s15 = int_to_ptr.vmem [resolvable:$true] %s56_s15  ;;  %s26_s17 = int_to_ptr.vmem [resolvable:$true] %s25_s17 }
  0x10   :  { %s898_s18 = scalar_lea.vmem %s57_s15, 1536  ;;  %p903_p6 = scmp.lt.s32.totalorder %s57_s15, %s57_s15 }
  0x11   :  { %p899_p5 = scmp.ne.s32.totalorder %s57_s15, %s898_s18  ;;  %p904_p7 = scmp.lt.s32.totalorder %s898_s18, %s898_s18 }
  0x13   :  { %p905_p8 = por %p904_p7, %p903_p6 }
  0x15   :  { %p906_p9 = pnand %p905_p8, %p899_p5 }
  0x17   :  { %909 = shalt.err (!%p906_p9)
}
  0x18   :  { %s1001_s19 = smov 128   ;;  %s1002_s20 = smov 8  }
  0x19   :  { %62 = dma.hbm_to_vmem [thread:$0]  %s1099_s3, 1536, %s57_s15, [#allocation10], %s1001_s19, %s1001_s19, %s1002_s20  }
  0x1a   :  { %s918_s1 = scalar_lea.vmem %s26_s17, 256  ;;  %p923_p11 = scmp.lt.s32.totalorder %s26_s17, %s26_s17 }
  0x1b   :  { %p919_p10 = scmp.ne.s32.totalorder %s26_s17, %s918_s1  ;;  %p924_p12 = scmp.lt.s32.totalorder %s918_s1, %s918_s1 }
  0x1d   :  { %p925_p13 = por %p924_p12, %p923_p11 }
  0x1f   :  { %p926_p0 = pnand %p925_p13, %p919_p10 }
  0x21   :  { %929 = shalt.err (!%p926_p0)
}
  0x22   :  { %28 = dma.hbm_to_vmem [thread:$0]  %s1096_s0, 256, %s26_s17, [#allocation4]  }
  0x23   :  { %s1003_s25 = smov [#allocation8]   ;;  %s1004_s27 = smov [#allocation11]  }
  0x24   :  { %s44_s26 = sshll.u32 %s1003_s25, 4  ;;  %s70_s28 = sshll.u32 %s1004_s27, 4  ;;  %s45_s26 = int_to_ptr.vmem [resolvable:$true] %s44_s26  ;;  %s71_s28 = int_to_ptr.vmem [resolvable:$true] %s70_s28 }
  0x25   :  { %s938_s29 = scalar_lea.vmem %s45_s26, 2560  ;;  %p943_p2 = scmp.lt.s32.totalorder %s45_s26, %s45_s26 }
  0x26   :  { %p939_p1 = scmp.ne.s32.totalorder %s45_s26, %s938_s29  ;;  %p944_p3 = scmp.lt.s32.totalorder %s938_s29, %s938_s29 }
  0x28   :  { %p945_p4 = por %p944_p3, %p943_p2 }
  0x2a   :  { %p946_p5 = pnand %p945_p4, %p939_p1 }
  0x2c   :  { %949 = shalt.err (!%p946_p5)
}
  0x2d   :  { %50 = dma.hbm_to_vmem [thread:$0]  %s1098_s2, 2560, %s45_s26, [#allocation7], %s1001_s19, %s1001_s19, %s1002_s20  }
  0x2e   :  { %s958_s0 = scalar_lea.vmem %s71_s28, 4096  ;;  %p963_p7 = scmp.lt.s32.totalorder %s71_s28, %s71_s28 }
  0x2f   :  { %p959_p6 = scmp.ne.s32.totalorder %s71_s28, %s958_s0  ;;  %p964_p8 = scmp.lt.s32.totalorder %s958_s0, %s958_s0 }
  0x31   :  { %p965_p9 = por %p964_p8, %p963_p7 }
  0x33   :  { %p966_p10 = pnand %p965_p9, %p959_p6 }
  0x35   :  { %969 = shalt.err (!%p966_p10)
}
  0x36   :  { %76 = dma.hbm_to_vmem [thread:$0]  %s1101_s5, 4096, %s71_s28, [#allocation10], %s1001_s19, %s1001_s19, %s1002_s20  }
  0x37   :  { %990 = dma.done.wait [#allocation4], 256  }
  0x38   :  { %991 = vsyncadd [#allocation4], 4294967040 }
  0x39   :  { %992 = dma.done.wait [#allocation7], 2688  }
  0x3a   :  { %993 = vsyncadd [#allocation7], 4294964608 }
  0x3b   :  { %994 = dma.done.wait [#allocation10], 5632  }
  0x3c   :  { %995 = vsyncadd [#allocation10], 4294961664  ;;  %v1005_v0 = vmov 0   ;;  %v774_v1 = vld [vmem:[#allocation9 + $0x54] ss:$8 sps:$4 sm:$0xff]   ;;  %vm197_vm0 = vcmask 785408  }
  0x3d   :  { %233 = vmatprep.mubr.bf16.mxu1 %v1005_v0  ;;  %v776_v2 = vld [vmem:[#allocation9 + $0x50] ss:$8 sps:$4 sm:$0xff]   ;;  %205 = vmatprep.subr.bf16.mxu1 %v774_v1  ;;  %v777_v3 = vld [vmem:[#allocation9 + $0x44] ss:$8 sps:$4 sm:$0xff]   ;;  %v779_v4 = vld [vmem:[#allocation9 + $0x40] ss:$8 sps:$4 sm:$0xff]  }
  0x3e   :  { %206 = vmatpush1.bf16.msra.mxu1 %v776_v2  ;;  %v780_v5 = vld [vmem:[#allocation9 + $0x34] ss:$8 sps:$4 sm:$0xff]   ;;  %v782_v6 = vld [vmem:[#allocation9 + $0x30] ss:$8 sps:$4 sm:$0xff]   ;;  %v783_v7 = vld [vmem:[#allocation9 + $0x24] ss:$8 sps:$4 sm:$0xff]  }
  0x3f   :  { %207 = vmatprep.subr.bf16.mxu1 %v777_v3  ;;  %v785_v8 = vld [vmem:[#allocation9 + $0x20] ss:$8 sps:$4 sm:$0xff]   ;;  %v786_v9 = vld [vmem:[#allocation9 + $0x14] ss:$8 sps:$4 sm:$0xff]   ;;  %v788_v10 = vld [vmem:[#allocation9 + $0x10] ss:$8 sps:$4 sm:$0xff]  }
  0x40   :  { %v789_v11 = vld [vmem:[#allocation9 + $0x4] ss:$8 sps:$4 sm:$0xff]   ;;  %v791_v12 = vld [vmem:[#allocation9] ss:$8 sps:$4 sm:$0xff]   ;;  %v123_v13 = vld [vmem:[#allocation6] sm:$0xff]  ;;  %vm342_vm1 = vcmask 261120  }
  0x41   :  { %v794_v14 = vld [vmem:[#allocation8 + $0x74] ss:$8 sps:$4 sm:$0xff]   ;;  %v124_v16 = vpack.c.bf16 %v123_v13, %v123_v13  ;;  %v792_v17 = vld [vmem:[#allocation8 + $0x70] ss:$8 sps:$4 sm:$0xff]   ;;  %v797_v21 = vld [vmem:[#allocation8 + $0x64] ss:$8 sps:$4 sm:$0xff]  }
  0x42   :  { %208 = vmatpush1.bf16.msra.mxu1 %v779_v4  ;;  %v100_v15 = vld [vmem:[#allocation3 + $0x8] sm:$0xff]  ;;  %v825_v22 = vld [vmem:[#allocation11 + $0x64] ss:$8 sps:$4 sm:$0xff]   ;;  %v795_v23 = vld [vmem:[#allocation8 + $0x60] ss:$8 sps:$4 sm:$0xff]   ;;  %vm680_vm2 = vcmask 57344  }
  0x43   :  { %209 = vmatprep.subr.bf16.mxu1 %v780_v5  ;;  %v102_v18 = vpack.c.bf16 %v100_v15, %v100_v15  ;;  %v822_v19 = vld [vmem:[#allocation11 + $0x74] ss:$8 sps:$4 sm:$0xff]   ;;  %v824_v20 = vld [vmem:[#allocation11 + $0x70] ss:$8 sps:$4 sm:$0xff]   ;;  %v827_v24 = vld [vmem:[#allocation11 + $0x60] ss:$8 sps:$4 sm:$0xff]  }
  0x44   :  { %609 = vmatprep.subr.bf16.mxu0 %v822_v19  ;;  %v800_v25 = vld [vmem:[#allocation8 + $0x54] ss:$8 sps:$4 sm:$0xff]   ;;  %v830_v27 = vld [vmem:[#allocation11 + $0x50] ss:$8 sps:$4 sm:$0xff]   ;;  %v803_v29 = vld [vmem:[#allocation8 + $0x44] ss:$8 sps:$4 sm:$0xff]  }
  0x45   :  { %610 = vmatpush1.bf16.msra.mxu0 %v824_v20  ;;  %v828_v26 = vld [vmem:[#allocation11 + $0x54] ss:$8 sps:$4 sm:$0xff]   ;;  %v798_v28 = vld [vmem:[#allocation8 + $0x50] ss:$8 sps:$4 sm:$0xff]   ;;  %v801_v30 = vld [vmem:[#allocation8 + $0x40] ss:$8 sps:$4 sm:$0xff]  }
  0x46   :  { %210 = vmatpush1.bf16.msra.mxu1 %v782_v6  ;;  %611 = vmatprep.subr.bf16.mxu0 %v825_v22  ;;  %v806_v31 = vld [vmem:[#allocation8 + $0x34] ss:$8 sps:$4 sm:$0xff]   ;;  %v804_v32 = vld [vmem:[#allocation8 + $0x30] ss:$8 sps:$4 sm:$0xff]   ;;  %v809_v33 = vld [vmem:[#allocation8 + $0x24] ss:$8 sps:$4 sm:$0xff]  }
  0x47   :  { %211 = vmatprep.subr.bf16.mxu1 %v783_v7  ;;  %v807_v34 = vld [vmem:[#allocation8 + $0x20] ss:$8 sps:$4 sm:$0xff]   ;;  %v812_v35 = vld [vmem:[#allocation8 + $0x14] ss:$8 sps:$4 sm:$0xff]   ;;  %v810_v36 = vld [vmem:[#allocation8 + $0x10] ss:$8 sps:$4 sm:$0xff]  }
  0x48   :  { %v815_v37 = vld [vmem:[#allocation8 + $0x4] ss:$8 sps:$4 sm:$0xff]   ;;  %v813_v38 = vld [vmem:[#allocation8] ss:$8 sps:$4 sm:$0xff]   ;;  %v818_v39 = vld [vmem:[#allocation8 + $0x94] ss:$8 sps:$4 sm:$0xff]  }
  0x49   :  { %612 = vmatpush1.bf16.msra.mxu0 %v827_v24  ;;  %v816_v40 = vld [vmem:[#allocation8 + $0x90] ss:$8 sps:$4 sm:$0xff]   ;;  %v821_v41 = vld [vmem:[#allocation8 + $0x84] ss:$8 sps:$4 sm:$0xff]   ;;  %v819_v42 = vld [vmem:[#allocation8 + $0x80] ss:$8 sps:$4 sm:$0xff]  }
  0x4a   :  { %212 = vmatpush1.bf16.msra.mxu1 %v785_v8  ;;  %613 = vmatprep.subr.bf16.mxu0 %v828_v26  ;;  %v99_v43 = vld [vmem:[#allocation3] sm:$0xff]  ;;  %v834_v47 = vld [vmem:[#allocation11 + $0x34] ss:$8 sps:$4 sm:$0xff]   ;;  %v836_v48 = vld [vmem:[#allocation11 + $0x30] ss:$8 sps:$4 sm:$0xff]  }
  0x4b   :  { %213 = vmatprep.subr.bf16.mxu1 %v786_v9  ;;  %v101_v44 = vpack.c.bf16 %v99_v43, %v99_v43  ;;  %v831_v45 = vld [vmem:[#allocation11 + $0x44] ss:$8 sps:$4 sm:$0xff]   ;;  %v833_v46 = vld [vmem:[#allocation11 + $0x40] ss:$8 sps:$4 sm:$0xff]   ;;  %v840_v51 = vld [vmem:[#allocation11 + $0x14] ss:$8 sps:$4 sm:$0xff]  }
  0x4c   :  { %v837_v49 = vld [vmem:[#allocation11 + $0x24] ss:$8 sps:$4 sm:$0xff]   ;;  %v839_v50 = vld [vmem:[#allocation11 + $0x20] ss:$8 sps:$4 sm:$0xff]   ;;  %v842_v52 = vld [vmem:[#allocation11 + $0x10] ss:$8 sps:$4 sm:$0xff]  }
  0x4d   :  { %614 = vmatpush1.bf16.msra.mxu0 %v830_v27  ;;  %v843_v53 = vld [vmem:[#allocation11 + $0x4] ss:$8 sps:$4 sm:$0xff]   ;;  %v845_v54 = vld [vmem:[#allocation11] ss:$8 sps:$4 sm:$0xff]   ;;  %v846_v55 = vld [vmem:[#allocation11 + $0xf4] ss:$8 sps:$4 sm:$0xff]  }
  0x4e   :  { %214 = vmatpush1.bf16.msra.mxu1 %v788_v10  ;;  %615 = vmatprep.subr.bf16.mxu0 %v831_v45  ;;  %v848_v56 = vld [vmem:[#allocation11 + $0xf0] ss:$8 sps:$4 sm:$0xff]   ;;  %v849_v57 = vld [vmem:[#allocation11 + $0xe4] ss:$8 sps:$4 sm:$0xff]   ;;  %v851_v58 = vld [vmem:[#allocation11 + $0xe0] ss:$8 sps:$4 sm:$0xff]  }
  0x4f   :  { %215 = vmatprep.subr.bf16.mxu1 %v789_v11  ;;  %v852_v59 = vld [vmem:[#allocation11 + $0xd4] ss:$8 sps:$4 sm:$0xff]   ;;  %v854_v60 = vld [vmem:[#allocation11 + $0xd0] ss:$8 sps:$4 sm:$0xff]   ;;  %v855_v61 = vld [vmem:[#allocation11 + $0xc4] ss:$8 sps:$4 sm:$0xff]   ;;  %v389_v11 = vlaneseq }
  0x50   :  { %v857_v62 = vld [vmem:[#allocation11 + $0xc0] ss:$8 sps:$4 sm:$0xff]   ;;  %v858_v63 = vld [vmem:[#allocation11 + $0xb4] ss:$8 sps:$4 sm:$0xff]   ;;  %v860_v0 = vld [vmem:[#allocation11 + $0xb0] ss:$8 sps:$4 sm:$0xff]  }
  0x51   :  { %616 = vmatpush1.bf16.msra.mxu0 %v833_v46  ;;  %v861_v1 = vld [vmem:[#allocation11 + $0xa4] ss:$8 sps:$4 sm:$0xff]   ;;  %v863_v2 = vld [vmem:[#allocation11 + $0xa0] ss:$8 sps:$4 sm:$0xff]   ;;  %v864_v3 = vld [vmem:[#allocation11 + $0x94] ss:$8 sps:$4 sm:$0xff]  }
  0x52   :  { %216 = vmatpush1.bf16.msra.mxu1 %v791_v12  ;;  %617 = vmatprep.subr.bf16.mxu0 %v834_v47  ;;  %v866_v4 = vld [vmem:[#allocation11 + $0x90] ss:$8 sps:$4 sm:$0xff]   ;;  %v867_v5 = vld [vmem:[#allocation11 + $0x84] ss:$8 sps:$4 sm:$0xff]   ;;  %v869_v6 = vld [vmem:[#allocation11 + $0x80] ss:$8 sps:$4 sm:$0xff]  }
  0x53   :  { %346 = vmatprep.subr.bf16.mxu1 %v794_v14  ;;  %v390_v12 = vshrl.u32 %v389_v11, 7  ;;  %v387_v14 = vld [vmem:[%s1100_s4] sm:$0x3]  ;;  %v674_v47 = vand.u32 127, %v389_v11 }
  0x55   :  { %711 = vmatmul.mubr.msk.bf16.vlgmr.msra.gmra.mxu1 %vm197_vm0, %v124_v16  ;;  %618 = vmatpush1.bf16.msra.mxu0 %v836_v48  ;;  %v391_v13 = vsub.s32 0, %v390_v12  ;;  %v395_v15 = vsub.s32 1, %v390_v12  ;;  %v670_v48 = vstv %s1104_s8 }
  0x56   :  { %347 = vmatpush1.bf16.msra.mxu1 %v792_v17  ;;  %732 = vmatprep.mubr.msk.bf16.mxu1 %vm342_vm1, %v102_v18 }
  0x57   :  { %348 = vmatprep.subr.bf16.mxu1 %v797_v21  ;;  %619 = vmatprep.subr.bf16.mxu0 %v837_v49  ;;  %v392_v16 = vrot.slane %v387_v14, %v391_v13  ;;  %v396_v19 = vrot.slane %v387_v14, %v395_v15  ;;  %v677_v49 = vsub.s32 %v674_v47, %v390_v12 }
  0x59   :  { %620 = vmatpush1.bf16.msra.mxu0 %v839_v50 }
  0x5a   :  { %349 = vmatpush1.bf16.msra.mxu1 %v795_v23  ;;  %621 = vmatprep.subr.bf16.mxu0 %v840_v51 }
  0x5b   :  { %350 = vmatprep.subr.bf16.mxu1 %v800_v25 }
  0x5d   :  { %622 = vmatpush1.bf16.msra.mxu0 %v842_v52 }
  0x5e   :  { %351 = vmatpush1.bf16.msra.mxu1 %v798_v28  ;;  %623 = vmatprep.subr.bf16.mxu0 %v843_v53 }
  0x5f   :  { %352 = vmatprep.subr.bf16.mxu1 %v803_v29 }
  0x61   :  { %624 = vmatpush1.bf16.msra.mxu0 %v845_v54 }
  0x62   :  { %353 = vmatpush1.bf16.msra.mxu1 %v801_v30  ;;  %625 = vmatprep.subr.bf16.mxu0 %v846_v55  ;;  %v437_v30 = vld [vmem:[%s1102_s6] sm:$0x3] }
  0x63   :  { %354 = vmatprep.subr.bf16.mxu1 %v806_v31  ;;  %v442_v31 = vrot.slane %v437_v30, %v391_v13 }
  0x65   :  { %626 = vmatpush2.bf16.msra.mxu0 %v848_v56 }
  0x66   :  { %355 = vmatpush1.bf16.msra.mxu1 %v804_v32  ;;  %627 = vmatprep.subr.bf16.mxu0 %v849_v57  ;;  %v446_v32 = vrot.slane %v437_v30, %v395_v15 }
  0x67   :  { %356 = vmatprep.subr.bf16.mxu1 %v809_v33 }
  0x69   :  { %628 = vmatpush2.bf16.msra.mxu0 %v851_v58 }
  0x6a   :  { %357 = vmatpush1.bf16.msra.mxu1 %v807_v34  ;;  %629 = vmatprep.subr.bf16.mxu0 %v852_v59  ;;  %v652_v34 = vld [vmem:[%s1103_s7] sm:$0x3]  ;;  %s1006_s7 = smov [#allocation12]  }
  0x6b   :  { %358 = vmatprep.subr.bf16.mxu1 %v812_v35  ;;  %s688_s16 = sshll.u32 %s1006_s7, 4  ;;  %s689_s16 = int_to_ptr.vmem [resolvable:$true] %s688_s16 }
  0x6c   :  { %s970_s17 = scalar_lea.vmem %s689_s16, 16  ;;  %s974_s18 = scalar_lea.vmem %s689_s16, 32 }
  0x6d   :  { %630 = vmatpush2.bf16.msra.mxu0 %v854_v60  ;;  %p971_p11 = scmp.ne.s32.totalorder %s689_s16, %s970_s17  ;;  %p975_p12 = scmp.lt.s32.totalorder %s689_s16, %s689_s16 }
  0x6e   :  { %359 = vmatpush1.bf16.msra.mxu1 %v810_v36  ;;  %631 = vmatprep.subr.bf16.mxu0 %v855_v61  ;;  %p976_p13 = scmp.lt.s32.totalorder %s974_s18, %s970_s17 }
  0x6f   :  { %360 = vmatprep.subr.bf16.mxu1 %v815_v37 }
  0x70   :  { %p977_p0 = por %p976_p13, %p975_p12 }
  0x71   :  { %632 = vmatpush2.bf16.msra.mxu0 %v857_v62 }
  0x72   :  { %361 = vmatpush1.bf16.msra.mxu1 %v813_v38  ;;  %633 = vmatprep.subr.bf16.mxu0 %v858_v63  ;;  %p978_p1 = pnand %p977_p0, %p971_p11 }
  0x73   :  { %374 = vmatprep.subr.bf16.mxu1 %v818_v39  ;;  %v657_v39 = vrot.slane %v652_v34, %v391_v13 }
  0x75   :  { %634 = vmatpush2.bf16.msra.mxu0 %v860_v0 }
  0x76   :  { %375 = vmatpush2.bf16.msra.mxu1 %v816_v40  ;;  %635 = vmatprep.subr.bf16.mxu0 %v861_v1  ;;  %v661_v40 = vrot.slane %v652_v34, %v395_v15 }
  0x77   :  { %376 = vmatprep.subr.bf16.mxu1 %v821_v41 }
  0x79   :  { %636 = vmatpush2.bf16.msra.mxu0 %v863_v2 }
  0x7a   :  { %377 = vmatpush2.bf16.msra.mxu1 %v819_v42  ;;  %637 = vmatprep.subr.bf16.mxu0 %v864_v3 }
  0x7d   :  { %379 = vmatmul.mubr.bf16.vlgmr.msra.gmra.mxu1 %v101_v44  ;;  %638 = vmatpush2.bf16.msra.mxu0 %v866_v4 }
  0x7e   :  { %639 = vmatprep.subr.bf16.mxu0 %v867_v5 }
  0x81   :  { %640 = vmatpush2.bf16.msra.mxu0 %v869_v6 }
 0x115   :  { %v235_v7 = vpop.f32.mrf.mxu1 }
 0x117   :  { %v237_v8 = vpop.f32.mrf.mxu1 }
 0x119   :  { %v239_v9 = vpop.f32.mrf.mxu1 }
 0x11b   :  { %v240_v10 = vpop.f32.mrf.mxu1 }
 0x13d   :  { %v380_v17 = vpop.f32.mrf.mxu1 }
 0x13e   :  { %v381_v18 = vadd.f32 %v380_v17, %v235_v7 }
 0x13f   :  { %v382_v20 = vpop.f32.mrf.mxu1 }
 0x140   :  { %v399_v21 = vadd.f32 %v392_v16, %v381_v18  ;;  %v383_v22 = vadd.f32 %v382_v20, %v237_v8 }
 0x141   :  { %v384_v23 = vpop.f32.mrf.mxu1 }
 0x142   :  { %v400_v24 = vadd.f32 %v396_v19, %v383_v22  ;;  %v401_v25 = vmax.f32 %v399_v21, 0.0 }
 0x143   :  { %v385_v26 = vpop.f32.mrf.mxu1 }
 0x144   :  { %v402_v27 = vmax.f32 %v400_v24, 0.0  ;;  %v403_v29 = vpack.c.bf16 %v401_v25, %v401_v25 }
 0x146   :  { %v404_v28 = vpack.c.bf16 %v402_v27, %v402_v27 }
 0x148   :  { %641 = vmatprep.mubr.bf16.mxu0 %v404_v28 }
 0x149   :  { %642 = vmatmul.mubr.bf16.vlgmr.msra.gmra.mxu0 %v403_v29 }
 0x209   :  { %v643_v33 = vpop.f32.mrf.mxu0 }
 0x20a   :  { %v644_v35 = vadd.f32 %v643_v33, %v442_v31 }
 0x20b   :  { %v645_v36 = vpop.f32.mrf.mxu0 }
 0x20c   :  { %v650_v37 = vmax.f32 %v644_v35, 0.0  ;;  %v646_v38 = vadd.f32 %v645_v36, %v446_v32 }
 0x20d   :  { %v647_v41 = vpop.f32.mrf.mxu0 }
 0x20e   :  { %v651_v42 = vmax.f32 %v646_v38, 0.0  ;;  %v664_v44 = vmul.f32 %v657_v39, %v650_v37 }
 0x20f   :  { %v648_v43 = vpop.f32.mrf.mxu0 }
 0x210   :  { %v665_v45 = vmul.f32 %v661_v40, %v651_v42 }
 0x212   :  { %v666_v46 = vadd.f32 %v665_v45, %v664_v44 }
 0x214   :  { %667 = vadd.xlane.f32.xlu0 %v666_v46 }
 0x29d   :  { %v668_v50 = vpop.xlane.xlu0 %667 }
 0x29e   :  { %v671_v51 = vadd.f32 %v670_v48, %v668_v50 }
 0x2a0   :  { %v678_v52 = vrot.slane %v671_v51, %v677_v49 }
 0x2a2   :  { %681 = vst.msk [vmem:[#allocation12] sm:$0x1] %vm680_vm2, %v678_v52 }
 0x2a3   :  { %981 = shalt.err (!%p978_p1)
}
 0x2a4   :  { %691 = dma.vmem_to_hbm [thread:$0]  %s689_s16, 16, %s1105_s9, [#allocation5]  }
 0x2a5   :  { %996 = dma.done.wait [#allocation5], 16  }
 0x2a6   :  { %997 = vsyncadd [#allocation5], 4294967280 }
 0x2a7   :  { %695 = vsyncpa [#allocation4], 1 }
 0x2a8   :  { %696 = vsyncpa [#allocation7], 1 }
 0x2a9   :  { %697 = vsyncpa [#allocation10], 1 }
 0x2aa   :  { %698 = vsyncpa [#allocation5], 1 }

</bundles_post_ra>
